<compile_context>
chip_gen: v7x
topology: tpu7x:2x2x1
jax: 0.10.0
libtpu: 0.0.40
codegen_flags: <defaults>
</compile_context>

<pallas_src>
import functools

import jax
import jax.numpy as jnp
from jax.experimental import pallas as pl
from jax.experimental.pallas import tpu as pltpu


def _round_up(v, m):
    return (v + m - 1) // m * m


def _hw_params():
    """Generation-aware per-input block target / VMEM budget / TC-split hint."""
    vmem_cap = 128 << 20
    try:
        info = pltpu.get_tpu_info()
        cap = getattr(info, "vmem_capacity_bytes", None)
        if cap:
            vmem_cap = int(cap)
    except Exception:
        pass
    kind = ""
    try:
        kind = jax.devices()[0].device_kind.lower()
    except Exception:
        pass

    if vmem_cap <= (64 << 20) or "7" in kind:
        # v7x-class: 64 MiB VMEM/TC, 3.2 TB/s HBM, 2 TensorCores per chip.
        # ~8 MiB blocks keep the 0.35 us/step overhead <~6% while 2x2 buffers
        # + scratch stay well under the 48 MiB cap.
        return dict(target_block_bytes=8 << 20, vmem_budget=48 << 20,
                    split_rows_for_cores=True)
    if "v5" in kind:
        # v5e: ~820 GB/s HBM -> a 8 MiB step is ~10 us, per-step overhead <4%.
        return dict(target_block_bytes=8 << 20, vmem_budget=64 << 20,
                    split_rows_for_cores=False)
    # v6e-class: 128 MiB VMEM, ~1.4 TB/s HBM -> go big to amortize step cost.
    return dict(target_block_bytes=14 << 20, vmem_budget=100 << 20,
                split_rows_for_cores=False)


def _soft_dice_kernel(x_ref, y_ref, dc_ref, tp_ref, sxy_ref, *,
                      smooth, n_valid, hw, tn, thw, mask_rows, mask_cols):
    i = pl.program_id(0)          # row-tile index over B*C rows  ("parallel")
    j = pl.program_id(1)          # spatial-tile index over H*W   ("arbitrary")
    last_j = pl.num_programs(1) - 1

    @pl.when(j == 0)
    def _init():
        tp_ref[...] = jnp.zeros_like(tp_ref)
        sxy_ref[...] = jnp.zeros_like(sxy_ref)

    # Cast on the VPU (spare slots) so bf16/int inputs only move their native
    # HBM bytes; for f32 inputs this is a no-op.
    x = x_ref[...].astype(jnp.float32)          # (tn, thw)
    y = y_ref[...].astype(jnp.float32)          # (tn, thw)

    def _accum(xv, yv):
        # 2*tp + fp + fn == sum(x) + sum(y): only two reduction streams.
        tp_ref[...] += jnp.sum(xv * yv, axis=-1, keepdims=True)     # (tn, 1)
        sxy_ref[...] += jnp.sum(xv + yv, axis=-1, keepdims=True)    # (tn, 1)

    if mask_cols:
        # Only the ragged last HW tile pays for the column mask; every other
        # tile runs the mask-free path (keeps the kernel HBM-bound on v7x).
        @pl.when(j != last_j)
        def _full_tile():
            _accum(x, y)

        @pl.when(j == last_j)
        def _ragged_tile():
            col = j * thw + jax.lax.broadcasted_iota(jnp.int32, (1, thw), 1)
            in_range = col < hw                  # (1, thw), broadcast in select
            _accum(jnp.where(in_range, x, 0.0), jnp.where(in_range, y, 0.0))
    else:
        _accum(x, y)

    @pl.when(j == last_j)
    def _finalize():
        tp = tp_ref[...]                                        # (tn, 1)
        # Exact divide (tiny: tn values once per row tile) keeps 1e-5 accuracy.
        dc = (2.0 * tp + smooth) / (sxy_ref[...] + smooth)
        if mask_rows:
            # Padded rows hold stale/garbage partials; the lane select drops
            # any NaN/Inf before the cross-row sum below.
            row = i * tn + jax.lax.broadcasted_iota(jnp.int32, (tn, 1), 0)
            dc = jnp.where(row < n_valid, dc, 0.0)
        # Per-row-tile partial sum, written as one lane-dense (1,8,128) splat
        # (unmasked vst; negligible output bytes, no tn x 128 padded buffer).
        s = jnp.sum(dc, axis=0, keepdims=True)                  # (1, 1)
        dc_ref[...] = jnp.broadcast_to(s.reshape(1, 1, 1), dc_ref.shape)


def soft_dice_loss(x, y, smooth=1.0, *, target_block_bytes=None):
    """Pallas implementation of SoftDiceLoss(smooth, dims=(-2, -1)).forward(x, y)."""
    assert x.shape == y.shape and x.ndim == 4
    B, C, H, W = x.shape
    N = B * C
    HW = H * W

    params = _hw_params()
    if target_block_bytes is None:
        target_block_bytes = params["target_block_bytes"]
    vmem_budget = params["vmem_budget"]
    split_rows = params["split_rows_for_cores"]

    # Reshape only (contiguous collapse, no copy); keep native dtypes.
    xf = x.reshape(N, HW)
    yf = y.reshape(N, HW)

    x_isz = jnp.dtype(xf.dtype).itemsize
    y_isz = jnp.dtype(yf.dtype).itemsize
    isz = max(x_isz, y_isz)
    row_align = max(8, 32 // isz)        # 8 for f32, 16 for bf16, 32 for int8

    # ---- tile selection: tile HW only when one row-stripe would overflow ----
    if row_align * HW * isz <= target_block_bytes:
        thw = HW                          # whole spatial extent in one block
    else:
        thw = max(128, (target_block_bytes // (row_align * isz)) // 128 * 128)
        thw = min(thw, _round_up(HW, 128))
    mask_cols = (HW % thw) != 0

    # Rows per block from the per-input byte budget (cap keeps the lane-padded
    # (tn,1) accumulator scratch bounded at ~8 MiB).
    tn = (target_block_bytes // (thw * isz)) // row_align * row_align
    tn = max(row_align, min(tn, 8192, _round_up(N, row_align)))

    # v7x: make sure the "parallel" row axis has >=2 tiles so the grid shards
    # across both TensorCores whenever the row count allows it.
    if split_rows and pl.cdiv(N, tn) < 2 and N > row_align:
        tn = max(row_align, _round_up(pl.cdiv(N, 2), row_align))
    # TODO(synk): for tiny-N / huge-HW shapes on v7x, split the HW axis across
    # cores instead (two half-HW partial outputs combined in the wrapper).

    # Shrink-to-fit against the generation VMEM budget (2 pipeline buffers per
    # input block + accumulator scratch + tiny output buffers + headroom).
    def _vmem_needed(tn_, thw_):
        block = tn_ * thw_ * (x_isz + y_isz)
        scratch = 2 * tn_ * 128 * 4
        out = 2 * 8 * 128 * 4
        return 2 * block + scratch + out

    while _vmem_needed(tn, thw) + (2 << 20) > vmem_budget and tn > row_align:
        tn = max(row_align, _round_up(tn // 2, row_align))

    num_rows = pl.cdiv(N, tn)
    num_hw = pl.cdiv(HW, thw)
    mask_rows = (num_rows * tn != N)

    kernel = functools.partial(
        _soft_dice_kernel, smooth=float(smooth), n_valid=N, hw=HW,
        tn=tn, thw=thw, mask_rows=mask_rows, mask_cols=mask_cols)

    vmem_needed = _vmem_needed(tn, thw)
    vmem_limit = int(min(max(vmem_needed + (2 << 20), 16 << 20), vmem_budget))

    cost = pl.CostEstimate(
        flops=4 * N * HW,
        transcendentals=0,
        bytes_accessed=xf.size * x_isz + yf.size * y_isz + num_rows * 8 * 128 * 4,
    )

    dc_parts = pl.pallas_call(
        kernel,
        out_shape=jax.ShapeDtypeStruct((num_rows, 8, 128), jnp.float32),
        grid_spec=pltpu.PrefetchScalarGridSpec(
            num_scalar_prefetch=0,
            grid=(num_rows, num_hw),
            in_specs=[
                pl.BlockSpec((tn, thw), lambda i, j: (i, j)),
                pl.BlockSpec((tn, thw), lambda i, j: (i, j)),
            ],
            out_specs=pl.BlockSpec((1, 8, 128), lambda i, j: (i, 0, 0)),
            scratch_shapes=[
                pltpu.VMEM((tn, 1), jnp.float32),   # tp partials
                pltpu.VMEM((tn, 1), jnp.float32),   # sum(x) + sum(y) partials
            ],
        ),
        compiler_params=pltpu.CompilerParams(
            dimension_semantics=("parallel", "arbitrary"),
            vmem_limit_bytes=vmem_limit,
        ),
        cost_estimate=cost,
    )(xf, yf)

    # Each row tile wrote its dice-sum splatted over a (1,8,128) block; padded
    # rows contributed exactly 0, so sum of the [.,0,0] scalars / N is the mean.
    return 1.0 - jnp.sum(dc_parts[:, 0, 0]) / jnp.float32(N)


def _soft_dice_loss_ref(x, y, smooth=1.0):
    # Pure-JAX reference, mirroring the PyTorch module exactly.
    x = x.astype(jnp.float32)
    y = y.astype(jnp.float32)
    tp = jnp.sum(x * y, axis=(-2, -1))
    fp = jnp.sum(x * (1.0 - y), axis=(-2, -1))
    fn = jnp.sum((1.0 - x) * y, axis=(-2, -1))
    dc = (2.0 * tp + smooth) / (2.0 * tp + fp + fn + smooth)
    return 1.0 - jnp.mean(dc)


if __name__ == "__main__":
    key = jax.random.PRNGKey(0)
    kx, ky, kx2, ky2, kx3, ky3 = jax.random.split(key, 6)

    # Primary shape from the module spec: NCHW = (2, 4, 16, 16), f32.
    B, C, H, W = 2, 4, 16, 16
    x = jax.random.uniform(kx, (B, C, H, W), dtype=jnp.float32)
    y = jnp.round(jax.random.uniform(ky, (B, C, H, W), dtype=jnp.float32))

    loss = jax.block_until_ready(soft_dice_loss(x, y, smooth=1.0))
    ref = _soft_dice_loss_ref(x, y, smooth=1.0)
    assert jnp.allclose(loss, ref, atol=1e-5, rtol=1e-5), (loss, ref)

    # Ragged row count / non-multiple-of-128 spatial size (row-mask path).
    x2 = jax.random.uniform(kx2, (1, 3, 10, 12), dtype=jnp.float32)
    y2 = jnp.round(jax.random.uniform(ky2, (1, 3, 10, 12), dtype=jnp.float32))
    loss2 = jax.block_until_ready(soft_dice_loss(x2, y2, smooth=1.0))
    ref2 = _soft_dice_loss_ref(x2, y2, smooth=1.0)
    assert jnp.allclose(loss2, ref2, atol=1e-5, rtol=1e-5), (loss2, ref2)

    # Force HW tiling with a ragged last tile (gated column-mask path) plus
    # padded rows, by shrinking the block-byte target.
    x3 = jax.random.uniform(kx3, (2, 2, 16, 40), dtype=jnp.float32)
    y3 = jnp.round(jax.random.uniform(ky3, (2, 2, 16, 40), dtype=jnp.float32))
    loss3 = jax.block_until_ready(
        soft_dice_loss(x3, y3, smooth=1.0, target_block_bytes=8192))
    ref3 = _soft_dice_loss_ref(x3, y3, smooth=1.0)
    assert jnp.allclose(loss3, ref3, atol=1e-5, rtol=1e-5), (loss3, ref3)

    print("KERNEL_OK")
</pallas_src>

<mosaic_0001>
module attributes {stable_mosaic.version = 11 : i64} {
  func.func @_soft_dice_kernel(%arg0: i32, %arg1: i32, %arg2: memref<8x256xf32, #tpu.memory_space<vmem>>, %arg3: memref<8x256xf32, #tpu.memory_space<vmem>>, %arg4: memref<1x8x128xf32, #tpu.memory_space<vmem>>, %arg5: memref<8x1xf32, #tpu.memory_space<vmem>>, %arg6: memref<8x1xf32, #tpu.memory_space<vmem>>) attributes {dimension_semantics = [#tpu.dimension_semantics<parallel>, #tpu.dimension_semantics<arbitrary>], iteration_bounds = array<i64: 1, 1>, scalar_prefetch = 0 : i64, scratch_operands = 2 : i64, tpu.core_type = #tpu.core_type<tc>, window_params = [{transform_indices = @transform_0, window_bounds = array<i64: 8, 256>}, {transform_indices = @transform_1, window_bounds = array<i64: 8, 256>}, {transform_indices = @transform_2, window_bounds = array<i64: 1, 8, 128>}]} {
    %c0_i32 = arith.constant 0 : i32
    %0 = arith.cmpi eq, %arg1, %c0_i32 : i32
    %1 = arith.extui %0 : i1 to i32
    %c0_i32_0 = arith.constant 0 : i32
    %2 = arith.cmpi ne, %1, %c0_i32_0 : i32
    scf.if %2 {
      %cst_15 = arith.constant 0.000000e+00 : f32
      %20 = vector.broadcast %cst_15 : f32 to vector<8x1xf32>
      %c0_16 = arith.constant 0 : index
      %c0_17 = arith.constant 0 : index
      %21 = vector.load %arg5[%c0_16, %c0_17] : memref<8x1xf32, #tpu.memory_space<vmem>>, vector<8x1xf32>
      tpu.vector_store %arg5[%c0_16, %c0_17], %20 {strides = array<i32>} : memref<8x1xf32, #tpu.memory_space<vmem>>, vector<8x1xf32>,
      %cst_18 = arith.constant 0.000000e+00 : f32
      %22 = vector.broadcast %cst_18 : f32 to vector<8x1xf32>
      %c0_19 = arith.constant 0 : index
      %c0_20 = arith.constant 0 : index
      %23 = vector.load %arg6[%c0_19, %c0_20] : memref<8x1xf32, #tpu.memory_space<vmem>>, vector<8x1xf32>
      tpu.vector_store %arg6[%c0_19, %c0_20], %22 {strides = array<i32>} : memref<8x1xf32, #tpu.memory_space<vmem>>, vector<8x1xf32>,
    } else {
    }
    %c0 = arith.constant 0 : index
    %c0_1 = arith.constant 0 : index
    %3 = vector.load %arg2[%c0, %c0_1] : memref<8x256xf32, #tpu.memory_space<vmem>>, vector<8x256xf32>
    %c0_2 = arith.constant 0 : index
    %c0_3 = arith.constant 0 : index
    %4 = vector.load %arg3[%c0_2, %c0_3] : memref<8x256xf32, #tpu.memory_space<vmem>>, vector<8x256xf32>
    %c0_4 = arith.constant 0 : index
    %c0_5 = arith.constant 0 : index
    %5 = vector.load %arg5[%c0_4, %c0_5] : memref<8x1xf32, #tpu.memory_space<vmem>>, vector<8x1xf32>
    %6 = arith.mulf %3, %4 : vector<8x256xf32>
    %cst = arith.constant dense<0.000000e+00> : vector<8xf32>
    %7 = vector.multi_reduction <add>, %6, %cst [1] : vector<8x256xf32> to vector<8xf32>
    %8 = vector.shape_cast %7 : vector<8xf32> to vector<8x1xf32>
    %9 = arith.addf %5, %8 : vector<8x1xf32>
    %c0_6 = arith.constant 0 : index
    %c0_7 = arith.constant 0 : index
    %10 = vector.load %arg5[%c0_6, %c0_7] : memref<8x1xf32, #tpu.memory_space<vmem>>, vector<8x1xf32>
    tpu.vector_store %arg5[%c0_6, %c0_7], %9 {strides = array<i32>} : memref<8x1xf32, #tpu.memory_space<vmem>>, vector<8x1xf32>,
    %c0_8 = arith.constant 0 : index
    %c0_9 = arith.constant 0 : index
    %11 = vector.load %arg6[%c0_8, %c0_9] : memref<8x1xf32, #tpu.memory_space<vmem>>, vector<8x1xf32>
    %12 = arith.addf %3, %4 : vector<8x256xf32>
    %cst_10 = arith.constant dense<0.000000e+00> : vector<8xf32>
    %13 = vector.multi_reduction <add>, %12, %cst_10 [1] : vector<8x256xf32> to vector<8xf32>
    %14 = vector.shape_cast %13 : vector<8xf32> to vector<8x1xf32>
    %15 = arith.addf %11, %14 : vector<8x1xf32>
    %c0_11 = arith.constant 0 : index
    %c0_12 = arith.constant 0 : index
    %16 = vector.load %arg6[%c0_11, %c0_12] : memref<8x1xf32, #tpu.memory_space<vmem>>, vector<8x1xf32>
    tpu.vector_store %arg6[%c0_11, %c0_12], %15 {strides = array<i32>} : memref<8x1xf32, #tpu.memory_space<vmem>>, vector<8x1xf32>,
    %c0_i32_13 = arith.constant 0 : i32
    %17 = arith.cmpi eq, %arg1, %c0_i32_13 : i32
    %18 = arith.extui %17 : i1 to i32
    %c0_i32_14 = arith.constant 0 : i32
    %19 = arith.cmpi ne, %18, %c0_i32_14 : i32
    scf.if %19 {
      %c0_15 = arith.constant 0 : index
      %c0_16 = arith.constant 0 : index
      %20 = vector.load %arg5[%c0_15, %c0_16] : memref<8x1xf32, #tpu.memory_space<vmem>>, vector<8x1xf32>
      %cst_17 = arith.constant 2.000000e+00 : f32
      %21 = vector.broadcast %cst_17 : f32 to vector<8x1xf32>
      %22 = arith.mulf %21, %20 : vector<8x1xf32>
      %cst_18 = arith.constant 1.000000e+00 : f32
      %23 = vector.broadcast %cst_18 : f32 to vector<8x1xf32>
      %24 = arith.addf %22, %23 : vector<8x1xf32>
      %c0_19 = arith.constant 0 : index
      %c0_20 = arith.constant 0 : index
      %25 = vector.load %arg6[%c0_19, %c0_20] : memref<8x1xf32, #tpu.memory_space<vmem>>, vector<8x1xf32>
      %cst_21 = arith.constant 1.000000e+00 : f32
      %26 = vector.broadcast %cst_21 : f32 to vector<8x1xf32>
      %27 = arith.addf %25, %26 : vector<8x1xf32>
      %28 = arith.divf %24, %27 : vector<8x1xf32>
      %cst_22 = arith.constant dense<0.000000e+00> : vector<1xf32>
      %29 = vector.multi_reduction <add>, %28, %cst_22 [0] : vector<8x1xf32> to vector<1xf32>
      %30 = vector.shape_cast %29 : vector<1xf32> to vector<1x1xf32>
      %31 = vector.shape_cast %30 : vector<1x1xf32> to vector<1x1x1xf32>
      %32 = vector.shape_cast %31 : vector<1x1x1xf32> to vector<1x1x1xf32>
      %33 = vector.broadcast %32 : vector<1x1x1xf32> to vector<1x8x128xf32>
      %c0_23 = arith.constant 0 : index
      %c0_24 = arith.constant 0 : index
      %c0_25 = arith.constant 0 : index
      %34 = vector.load %arg4[%c0_23, %c0_24, %c0_25] : memref<1x8x128xf32, #tpu.memory_space<vmem>>, vector<1x8x128xf32>
      tpu.vector_store %arg4[%c0_23, %c0_24, %c0_25], %33 {strides = array<i32>} : memref<1x8x128xf32, #tpu.memory_space<vmem>>, vector<1x8x128xf32>,
    } else {
    }
    return
  }
  func.func @transform_0(%arg0: i32, %arg1: i32) -> (i32, i32) {
    %c0_i32 = arith.constant 0 : i32
    return %arg0, %arg1 : i32, i32
  }
  func.func @transform_1(%arg0: i32, %arg1: i32) -> (i32, i32) {
    %c0_i32 = arith.constant 0 : i32
    return %arg0, %arg1 : i32, i32
  }
  func.func @transform_2(%arg0: i32, %arg1: i32) -> (i32, i32, i32) {
    %c0_i32 = arith.constant 0 : i32
    %c0_i32_0 = arith.constant 0 : i32
    %c0_i32_1 = arith.constant 0 : i32
    return %arg0, %c0_i32, %c0_i32_0 : i32, i32, i32
  }
}

</mosaic_0001>

<bundles_post_ra>
// kernel: tpu_custom_call.1
= control target key start
LH: loop header
LB: loop body
LE: loop exit
PB: predicated region body
PF: predicated region fallthrough
CT: control target
= control target key end

     0   :  { %7 = vsyncpa [#allocation5], 0  ;;  %s245_s0 = inlined_call_operand.hbm [shape: f32[8,256], index: 0, kind: input, shape index: {}]   ;;  %s246_s1 = inlined_call_operand.hbm [shape: f32[8,256], index: 1, kind: input, shape index: {}]   ;;  %s247_s2 = inlined_call_operand.hbm [shape: f32[1,8,128], index: 2, kind: output, shape index: {}]  }
   0x1   :  { %8 = vsyncpa [#allocation8], 0 }
   0x2   :  { %9 = vsyncpa [#allocation6], 0  ;;  %s184_s9 = smov [#allocation4]   ;;  %s185_s11 = smov [#allocation7]  }
   0x3   :  { %s16_s10 = sshll.u32 %s184_s9, 4  ;;  %s26_s12 = sshll.u32 %s185_s11, 4  ;;  %s17_s10 = int_to_ptr.vmem [resolvable:$true] %s16_s10  ;;  %s27_s12 = int_to_ptr.vmem [resolvable:$true] %s26_s12 }
   0x4   :  { %s112_s15 = scalar_lea.hbm %s245_s0, 256 }
   0x5   :  { %p113_p0 = scmp.ne.s32.totalorder %s245_s0, %s112_s15  ;;  %p116_p1 = scmp.lt.u32.totalorder %s112_s15, %s245_s0 }
   0x7   :  { %p118_p2 = pnand %p116_p1, %p113_p0 }
   0x9   :  { %121 = shalt.err (!%p118_p2)
}
   0xa   :  { %s122_s20 = scalar_lea.vmem %s17_s10, 256  ;;  %p127_p4 = scmp.lt.s32.totalorder %s17_s10, %s17_s10 }
   0xb   :  { %p123_p3 = scmp.ne.s32.totalorder %s17_s10, %s122_s20  ;;  %p128_p5 = scmp.lt.s32.totalorder %s122_s20, %s122_s20 }
   0xd   :  { %p129_p6 = por %p128_p5, %p127_p4 }
   0xf   :  { %p130_p7 = pnand %p129_p6, %p123_p3 }
  0x11   :  { %133 = shalt.err (!%p130_p7)
}
  0x12   :  { %19 = dma.hbm_to_vmem [thread:$0]  %s245_s0, 256, %s17_s10, [#allocation5]  }
  0x13   :  { %s134_s25 = scalar_lea.hbm %s246_s1, 256 }
  0x14   :  { %p135_p8 = scmp.ne.s32.totalorder %s246_s1, %s134_s25  ;;  %p138_p9 = scmp.lt.u32.totalorder %s134_s25, %s246_s1 }
  0x16   :  { %p140_p10 = pnand %p138_p9, %p135_p8 }
  0x18   :  { %143 = shalt.err (!%p140_p10)
}
  0x19   :  { %s144_s30 = scalar_lea.vmem %s27_s12, 256  ;;  %p149_p12 = scmp.lt.s32.totalorder %s27_s12, %s27_s12 }
  0x1a   :  { %p145_p11 = scmp.ne.s32.totalorder %s27_s12, %s144_s30  ;;  %p150_p13 = scmp.lt.s32.totalorder %s144_s30, %s144_s30 }
  0x1c   :  { %p151_p0 = por %p150_p13, %p149_p12 }
  0x1e   :  { %p152_p1 = pnand %p151_p0, %p145_p11 }
  0x20   :  { %155 = shalt.err (!%p152_p1)
}
  0x21   :  { %29 = dma.hbm_to_vmem [thread:$0]  %s246_s1, 256, %s27_s12, [#allocation8]  }
  0x22   :  { %178 = dma.done.wait [#allocation5], 256  }
  0x23   :  { %179 = vsyncadd [#allocation5], 4294967040 }
  0x24   :  { %180 = dma.done.wait [#allocation8], 256  }
  0x25   :  { %181 = vsyncadd [#allocation8], 4294967040  ;;  %vm40_vm0 = vcmask 7168   ;;  %v186_v0 = vmov 0.0   ;;  %v43_v1 = vld [vmem:[#allocation4] sm:$0xff]  ;;  %v44_v2 = vld [vmem:[#allocation4 + $0x8] sm:$0xff] }
  0x26   :  { %42 = vst.msk [vmem:[#allocation3] sm:$0xff] %vm40_vm0, %v186_v0  ;;  %41 = vst.msk [vmem:[#allocation2] sm:$0xff] %vm40_vm0, %v186_v0  ;;  %v45_v3 = vld [vmem:[#allocation7] sm:$0xff]  ;;  %v46_v4 = vld [vmem:[#allocation7 + $0x8] sm:$0xff]  ;;  %v187_v11 = vmov 0   ;;  %s188_s1 = smov [#allocation9]  }
  0x27   :  { %v57_v5 = vadd.f32 %v45_v3, %v43_v1  ;;  %v58_v6 = vadd.f32 %v46_v4, %v44_v2  ;;  %v48_v7 = vmul.f32 %v45_v3, %v43_v1  ;;  %v49_v8 = vmul.f32 %v46_v4, %v44_v2  ;;  %108 = vset.pattern.permute.xlu1 %v187_v11  ;;  %s93_s4 = sshll.u32 %s188_s1, 4  ;;  %s94_s4 = int_to_ptr.vmem [resolvable:$true] %s93_s4 }
  0x28   :  { %109 = vset.pattern.permute.xlu0 %v187_v11  ;;  %s156_s5 = scalar_lea.vmem %s94_s4, 128  ;;  %p161_p3 = scmp.lt.s32.totalorder %s94_s4, %s94_s4 }
  0x29   :  { %v59_v9 = vadd.f32 %v58_v6, %v57_v5  ;;  %v50_v10 = vadd.f32 %v49_v8, %v48_v7  ;;  %p157_p2 = scmp.ne.s32.totalorder %s94_s4, %s156_s5  ;;  %p162_p4 = scmp.lt.s32.totalorder %s156_s5, %s156_s5 }
  0x2b   :  { %60 = vadd.xlane.f32.xlu0 %v59_v9  ;;  %p163_p5 = por %p162_p4, %p161_p3 }
  0x2d   :  { %v56_v12 = vld [vmem:[#allocation3] sm:$0xff]  ;;  %v47_v15 = vld [vmem:[#allocation2] sm:$0xff]  ;;  %p164_p6 = pnand %p163_p5, %p157_p2 }
  0x2f   :  { %51 = vadd.xlane.f32.xlu0 %v50_v10 }
  0xb8   :  { %v61_v13 = vpop.xlane.xlu0 %60 }
  0xb9   :  { %v62_v14 = vadd.f32 %v61_v13, %v56_v12 }
  0xbb   :  { %63 = vst.msk [vmem:[#allocation3] sm:$0xff] %vm40_vm0, %v62_v14 }
  0xbc   :  { %v52_v16 = vpop.xlane.xlu0 %51 }
  0xbd   :  { %v53_v17 = vadd.f32 %v52_v16, %v47_v15 }
  0xbf   :  { %55 = vst.msk [vmem:[#allocation2] sm:$0xff] %vm40_vm0, %v53_v17 }
  0xc2   :  { %v70_v18 = vld [vmem:[#allocation3] sm:$0xff] }
  0xc3   :  { %v71_v19 = vadd.f32 1.0, %v70_v18 }
  0xc5   :  { %110 = vrcp.f32 %v71_v19 }
  0xc6   :  { %v67_v20 = vld [vmem:[#allocation2] sm:$0xff] }
  0xc7   :  { %v68_v21 = vmul.f32 2.0, %v67_v20 }
  0xc9   :  { %v69_v22 = vadd.f32 1.0, %v68_v21 }
  0xcf   :  { %v111_v23 = vpop.eup %110 }
  0xd0   :  { %v73_v24 = vmul.f32 %v111_v23, %v69_v22 }
  0xd2   :  { %v74_v25 = vsel %vm40_vm0, %v73_v24, 0.0 }
  0xd3   :  { %v75_v26 = vrot.slane %v74_v25, 4 }
  0xd5   :  { %v76_v27 = vadd.f32 %v75_v26, %v74_v25 }
  0xd7   :  { %v77_v28 = vrot.slane %v76_v27, 2 }
  0xd9   :  { %v78_v29 = vadd.f32 %v77_v28, %v76_v27 }
  0xdb   :  { %v79_v30 = vrot.slane %v78_v29, 1 }
  0xdd   :  { %v80_v31 = vadd.f32 %v79_v30, %v78_v29 }
  0xdf   :  { %83 = vperm.xlu1 %108, %v80_v31  }
 0x15e   :  { %v84_v32 = vpop.permute.xlu1 %83 }
 0x15f   :  { %86 = vst [vmem:[#allocation9] sm:$0xff] %v84_v32 }
 0x160   :  { %167 = shalt.err (!%p164_p6)
}
 0x161   :  { %s168_s8 = scalar_lea.hbm %s247_s2, 128 }
 0x162   :  { %p169_p7 = scmp.ne.s32.totalorder %s247_s2, %s168_s8  ;;  %p172_p8 = scmp.lt.u32.totalorder %s168_s8, %s247_s2 }
 0x164   :  { %p174_p9 = pnand %p172_p8, %p169_p7 }
 0x166   :  { %177 = shalt.err (!%p174_p9)
}
 0x167   :  { %96 = dma.vmem_to_hbm [thread:$0]  %s94_s4, 128, %s247_s2, [#allocation6]  }
 0x168   :  { %182 = dma.done.wait [#allocation6], 128  }
 0x169   :  { %183 = vsyncadd [#allocation6], 4294967168 }
 0x16a   :  { %100 = vsyncpa [#allocation5], 1 }
 0x16b   :  { %101 = vsyncpa [#allocation8], 1 }
 0x16c   :  { %102 = vsyncpa [#allocation6], 1 }

</bundles_post_ra>
